<compile_context>
chip_gen: v7x
topology: tpu7x:2x2x1
jax: 0.10.0
libtpu: 0.0.40
codegen_flags: <defaults>
</compile_context>

<pallas_src>
import functools

import jax
import jax.numpy as jnp
from jax.experimental import pallas as pl
from jax.experimental.pallas import tpu as pltpu


def _cln_kernel(x_ref, gamma_ref, beta_ref, o_ref, *, eps, channels):
    # x_ref / o_ref: (C, tile_hw) slab for one batch element
    #   (channels on sublanes, spatial positions on lanes -> lane-dense stores).
    x = x_ref[...].astype(jnp.float32)
    mean = jnp.mean(x, axis=0, keepdims=True)            # (1, tile_hw) sublane reduce
    diff = x - mean
    # torch .std() default is the UNBIASED estimator (ddof=1): divide by C-1.
    # NOTE: channels == 1 gives 0/0 -> NaN, matching torch's behavior.
    var = jnp.sum(diff * diff, axis=0, keepdims=True) / jnp.float32(channels - 1)
    std = jnp.sqrt(var)
    # eps is added to std (NOT var) per the reference module; do not "optimize"
    # to rsqrt(var + eps).  One reciprocal per position, then cheap VPU muls.
    inv = pl.reciprocal(std + jnp.float32(eps), approx=False)
    y = diff * inv
    g = gamma_ref[...]                                    # (C, 1) float32
    b = beta_ref[...]                                     # (C, 1) float32
    o_ref[...] = (y * g + b).astype(o_ref.dtype)


def _pick_tile_hw(hw, channels, itemsize):
    """Lane-dense spatial tile: multiple of 128, ~4 MiB per input block."""
    if hw <= 128:
        return hw                                  # full extent (always legal)
    target_bytes = 4 * 1024 * 1024
    target_elems = target_bytes // max(channels * itemsize, 1)
    tile = max(128, (target_elems // 128) * 128)   # multiple of 128 lanes
    hw_rounded = ((hw + 127) // 128) * 128         # never exceed the padded extent
    return min(tile, hw_rounded)


def channel_layer_norm(x, gamma, beta, eps=1e-5):
    """x: (B, C, *spatial) NCHW-style. Returns same shape/dtype."""
    B, C = x.shape[0], x.shape[1]
    hw = 1
    for d in x.shape[2:]:
        hw *= d

    # Free reshape (contiguous): NCHW -> (B, C, HW).  No transposes, no pad.
    x3 = x.reshape(B, C, hw)

    tile_hw = _pick_tile_hw(hw, C, jnp.dtype(x.dtype).itemsize)
    n_hw = pl.cdiv(hw, tile_hw)

    gamma2 = gamma.reshape(C, 1).astype(jnp.float32)
    beta2 = beta.reshape(C, 1).astype(jnp.float32)

    kernel = functools.partial(_cln_kernel, eps=eps, channels=C)

    out3 = pl.pallas_call(
        kernel,
        out_shape=jax.ShapeDtypeStruct((B, C, hw), x.dtype),
        grid_spec=pltpu.PrefetchScalarGridSpec(
            num_scalar_prefetch=0,
            grid=(B, n_hw),
            in_specs=[
                pl.BlockSpec((pl.Squeezed(), C, tile_hw), lambda b, j: (b, 0, j)),
                pl.BlockSpec((C, 1), lambda b, j: (0, 0)),
                pl.BlockSpec((C, 1), lambda b, j: (0, 0)),
            ],
            out_specs=pl.BlockSpec((pl.Squeezed(), C, tile_hw),
                                   lambda b, j: (b, 0, j)),
        ),
        compiler_params=pltpu.CompilerParams(
            # Both grid axes are independent -> shard freely across cores.
            dimension_semantics=("parallel", "parallel"),
            # Explicit budget: above v5e's 16 MiB default, within v7x's 64 MiB
            # physical; double-buffered ~4 MiB in + ~4 MiB out tiles (f32 path
            # <= ~16 MiB live) stay well under it.
            vmem_limit_bytes=32 * 1024 * 1024,
        ),
    )(x3, gamma2, beta2)

    return out3.reshape(x.shape)


def _reference(x, gamma, beta, eps=1e-5):
    x_cl = jnp.moveaxis(x, 1, -1).astype(jnp.float32)
    mean = jnp.mean(x_cl, axis=-1, keepdims=True)
    std = jnp.std(x_cl, axis=-1, keepdims=True, ddof=1)  # unbiased, like torch
    y = (x_cl - mean) / (std + eps)
    y = y * gamma + beta
    return jnp.moveaxis(y, -1, 1).astype(x.dtype)


if __name__ == "__main__":
    key = jax.random.PRNGKey(0)
    kx, kg, kb = jax.random.split(key, 3)

    B, C, H, W = 2, 4, 16, 16
    x = jax.random.normal(kx, (B, C, H, W), dtype=jnp.float32)

    # Module uses ones/zeros init; perturb to exercise the affine path.
    gamma = jnp.ones((C,), jnp.float32) + 0.1 * jax.random.normal(kg, (C,), jnp.float32)
    beta = 0.1 * jax.random.normal(kb, (C,), jnp.float32)

    out = channel_layer_norm(x, gamma, beta, eps=1e-5)
    out = jax.block_until_ready(out)

    ref = _reference(x, gamma, beta, eps=1e-5)
    assert out.shape == x.shape and out.dtype == x.dtype
    assert jnp.allclose(out, ref, atol=1e-5, rtol=1e-5), float(jnp.max(jnp.abs(out - ref)))

    print("KERNEL_OK")
</pallas_src>

<mosaic_0001>
module attributes {stable_mosaic.version = 11 : i64} {
  func.func @_cln_kernel(%arg0: i32, %arg1: i32, %arg2: memref<1x4x256xf32, #tpu.memory_space<vmem>>, %arg3: memref<4x1xf32, #tpu.memory_space<vmem>>, %arg4: memref<4x1xf32, #tpu.memory_space<vmem>>, %arg5: memref<1x4x256xf32, #tpu.memory_space<vmem>>) attributes {dimension_semantics = [#tpu.dimension_semantics<parallel>, #tpu.dimension_semantics<parallel>], iteration_bounds = array<i64: 2, 1>, scalar_prefetch = 0 : i64, scratch_operands = 0 : i64, tpu.core_type = #tpu.core_type<tc>, window_params = [{transform_indices = @transform_0, window_bounds = array<i64: 1, 4, 256>}, {pipeline_mode = #tpu.pipeline_mode<synchronous>, transform_indices = @transform_1, window_bounds = array<i64: 4, 1>}, {pipeline_mode = #tpu.pipeline_mode<synchronous>, transform_indices = @transform_2, window_bounds = array<i64: 4, 1>}, {transform_indices = @transform_3, window_bounds = array<i64: 1, 4, 256>}]} {
    %c0 = arith.constant 0 : index
    %c0_0 = arith.constant 0 : index
    %c0_1 = arith.constant 0 : index
    %0 = vector.load %arg2[%c0, %c0_0, %c0_1] : memref<1x4x256xf32, #tpu.memory_space<vmem>>, vector<1x4x256xf32>
    %1 = vector.shape_cast %0 : vector<1x4x256xf32> to vector<4x256xf32>
    %cst = arith.constant dense<0.000000e+00> : vector<256xf32>
    %2 = vector.multi_reduction <add>, %1, %cst [0] : vector<4x256xf32> to vector<256xf32>
    %3 = vector.shape_cast %2 : vector<256xf32> to vector<1x256xf32>
    %cst_2 = arith.constant 4.000000e+00 : f32
    %4 = vector.broadcast %cst_2 : f32 to vector<1x256xf32>
    %5 = arith.divf %3, %4 : vector<1x256xf32>
    %6 = vector.broadcast %5 : vector<1x256xf32> to vector<4x256xf32>
    %7 = arith.subf %1, %6 : vector<4x256xf32>
    %8 = arith.mulf %7, %7 : vector<4x256xf32>
    %cst_3 = arith.constant dense<0.000000e+00> : vector<256xf32>
    %9 = vector.multi_reduction <add>, %8, %cst_3 [0] : vector<4x256xf32> to vector<256xf32>
    %10 = vector.shape_cast %9 : vector<256xf32> to vector<1x256xf32>
    %cst_4 = arith.constant 3.000000e+00 : f32
    %11 = vector.broadcast %cst_4 : f32 to vector<1x256xf32>
    %12 = arith.divf %10, %11 : vector<1x256xf32>
    %13 = math.sqrt %12 : vector<1x256xf32>
    %cst_5 = arith.constant 9.99999974E-6 : f32
    %14 = vector.broadcast %cst_5 : f32 to vector<1x256xf32>
    %15 = arith.addf %13, %14 : vector<1x256xf32>
    %16 = tpu.reciprocal %15 : vector<1x256xf32> -> vector<1x256xf32>
    %17 = vector.broadcast %16 : vector<1x256xf32> to vector<4x256xf32>
    %18 = arith.mulf %7, %17 : vector<4x256xf32>
    %c0_6 = arith.constant 0 : index
    %c0_7 = arith.constant 0 : index
    %19 = vector.load %arg3[%c0_6, %c0_7] : memref<4x1xf32, #tpu.memory_space<vmem>>, vector<4x1xf32>
    %c0_8 = arith.constant 0 : index
    %c0_9 = arith.constant 0 : index
    %20 = vector.load %arg4[%c0_8, %c0_9] : memref<4x1xf32, #tpu.memory_space<vmem>>, vector<4x1xf32>
    %21 = vector.broadcast %19 : vector<4x1xf32> to vector<4x256xf32>
    %22 = arith.mulf %18, %21 : vector<4x256xf32>
    %23 = vector.broadcast %20 : vector<4x1xf32> to vector<4x256xf32>
    %24 = arith.addf %22, %23 : vector<4x256xf32>
    %c0_10 = arith.constant 0 : index
    %c0_11 = arith.constant 0 : index
    %c0_12 = arith.constant 0 : index
    %25 = vector.load %arg5[%c0_10, %c0_11, %c0_12] : memref<1x4x256xf32, #tpu.memory_space<vmem>>, vector<1x4x256xf32>
    %26 = vector.shape_cast %25 : vector<1x4x256xf32> to vector<4x256xf32>
    %27 = vector.shape_cast %24 : vector<4x256xf32> to vector<1x4x256xf32>
    tpu.vector_store %arg5[%c0_10, %c0_11, %c0_12], %27 {strides = array<i32>} : memref<1x4x256xf32, #tpu.memory_space<vmem>>, vector<1x4x256xf32>,
    return
  }
  func.func @transform_0(%arg0: i32, %arg1: i32) -> (i32, i32, i32) {
    %c0_i32 = arith.constant 0 : i32
    %c0_i32_0 = arith.constant 0 : i32
    return %arg0, %c0_i32, %arg1 : i32, i32, i32
  }
  func.func @transform_1(%arg0: i32, %arg1: i32) -> (i32, i32) {
    %c0_i32 = arith.constant 0 : i32
    %c0_i32_0 = arith.constant 0 : i32
    %c0_i32_1 = arith.constant 0 : i32
    return %c0_i32, %c0_i32_0 : i32, i32
  }
  func.func @transform_2(%arg0: i32, %arg1: i32) -> (i32, i32) {
    %c0_i32 = arith.constant 0 : i32
    %c0_i32_0 = arith.constant 0 : i32
    %c0_i32_1 = arith.constant 0 : i32
    return %c0_i32, %c0_i32_0 : i32, i32
  }
  func.func @transform_3(%arg0: i32, %arg1: i32) -> (i32, i32, i32) {
    %c0_i32 = arith.constant 0 : i32
    %c0_i32_0 = arith.constant 0 : i32
    return %arg0, %c0_i32, %arg1 : i32, i32, i32
  }
}

</mosaic_0001>

<bundles_post_ra>
// kernel: tpu_custom_call.1
= control target key start
LH: loop header
LB: loop body
LE: loop exit
PB: predicated region body
PF: predicated region fallthrough
CT: control target
= control target key end

     0   :  { %8 = vsyncpa [#allocation3], 0  ;;  %s823_s0 = inlined_call_operand.hbm [shape: f32[2,4,256], index: 0, kind: input, shape index: {}]   ;;  %s824_s1 = inlined_call_operand.vmem [shape: f32[4,1], index: 1, kind: input, shape index: {}]   ;;  %s825_s2 = inlined_call_operand.vmem [shape: f32[4,1], index: 2, kind: input, shape index: {}]   ;;  %s826_s3 = inlined_call_operand.hbm [shape: f32[2,4,256], index: 3, kind: output, shape index: {}]  }
   0x1   :  { %10 = vsyncpa [#allocation3 + $0x1], 0 }
   0x2   :  { %11 = vsyncpa [#allocation4], 0 }
   0x3   :  { %13 = vsyncpa [#allocation4 + $0x1], 0  ;;  %s637_s12 = smov 0   ;;  %s639_s13 = smov 0  }
   0x4   :  { %s641_s14 = smov 0   ;;  %s643_s15 = smov 0  }
   0x5   :  { %s645_s16 = smov 0   ;;  %s647_s17 = smov 0  }
   0x6 LB: > { %s408_s18 = sadd.s32 4294967295, %s611_s17   ;;  %s409_s19 = sadd.s32 4294967294, %s611_s17   ;;  %s611_s17 = sphi %s647_s17, %s19_s17   ;;  %s607_s16 = sphi %s645_s16, %s842_s16   ;;  %s603_s15 = sphi %s643_s15, %s841_s15   ;;  %s599_s14 = sphi %s641_s14, %s840_s14   ;;  %s595_s13 = sphi %s639_s13, %s839_s13   ;;  %s591_s12 = sphi %s637_s12, %s838_s12  }
   0x7   : > { %s31_s20 = sadd.s32 1, %s607_s16  ;;  %s40_s21 = sadd.s32 1, %s599_s14 }
   0x8   : > { %p33_p0 = scmp.ge.s32.totalorder %s31_s20, 2  ;;  %p47_p1 = scmp.ne.s32.totalorder %s599_s14, %s595_s13 }
   0x9   : > { %p48_p2 = scmp.eq.s32.totalorder %s611_s17, 0  ;;  %p53_p3 = scmp.ne.s32.totalorder %s595_s13, %s591_s12 }
   0xa   : > { %s844_s20 = smov (%p33_p0, %s31_s20), 0  ;;  %p54_p5 = scmp.eq.s32.totalorder %s408_s18, 0 }
   0xb   : > { %p678_p4 = por %p48_p2, %p47_p1  ;;  %s35_s23 = ssub.s32 %s607_s16, %s844_s20 }
   0xc   : > { %p121_p6 = scmp.eq.s32.totalorder %s408_s18, 1  ;;  %p38_p7 = scmp.eq.s32.totalorder %s35_s23, 0 }
   0xd   : > { %p684_p8 = por %p54_p5, %p53_p3  ;;  %p127_p10 = scmp.eq.s32.totalorder %s409_s19, 1 }
   0xe   : > { %p688_p9 = por %p121_p6, %p47_p1  ;;  %p437_p13 = scmp.lt.s32.totalorder %s611_s17, 2 }
   0xf   : > { %s693_s26 = scalar_select %p38_p7, %s599_s14, %s40_s21  }
  0x10   : > { %s830_s25 = scalar_select %p688_p9, 1, 0 }
  0x11   : > { %p695_p11 = por %p127_p10, %p53_p3  ;;  %s153_s28 = sand.u32 1, %s599_s14  }
  0x12   : > { %s412_s29 = sshll.u32 %s153_s28, 3  ;;  %s423_s30 = sshll.u32 %s607_s16, 7 }
  0x13   : > { %s831_s27 = scalar_select %p695_p11, 1, 0 }
  0x14   : > { %s706_s6 = scalar_lea.hbm %s823_s0, %s423_s30  ;;  %s157_s7 = scalar_lea.vmem [#allocation2], %s412_s29 }
  0x15   : > { %s167_s8 = sshll.u32 %s157_s7, 4  ;;  %p712_p0 = pnand %p437_p13, %p678_p4  ;;  %s708_s8 = int_to_ptr.vmem [resolvable:$true] %s167_s8 }
  0x16   : > { %s154_s10 = scalar_lea.sflag [#allocation3], %s153_s28  ;;  %s499_s11 = scalar_lea.hbm %s706_s6, 128 }
  0x17   : > { %p500_p3 = scmp.ne.s32.totalorder %s706_s6, %s499_s11  ;;  %p501_p5 = pneg %p712_p0 }
  0x18   : > { %s504_s21 = scalar_lea.hbm %s823_s0, 256  ;;  %p505_p4 = scmp.lt.u32.totalorder %s706_s6, %s823_s0 }
  0x19   : > { %p502_p6 = pnand %p501_p5, %p500_p3  ;;  %p506_p10 = scmp.lt.u32.totalorder %s504_s21, %s499_s11 }
  0x1a   : > { %p508_p12 = scmp.lt.u32.totalorder %s499_s11, %s706_s6 }
  0x1b   : > { %p503_p7 = pneg %p502_p6  ;;  %p507_p13 = por %p506_p10, %p505_p4 }
  0x1d   : > { %p509_p1 = por %p508_p12, %p507_p13 }
  0x1f   : > { %p510_p2 = pnand %p509_p1, %p503_p7 }
  0x21   : > { %513 = shalt.err (!%p510_p2)
}
  0x22   : > { %s514_s28 = scalar_lea.vmem %s708_s8, 128  ;;  %s613_s29 = smov [#allocation2]  }
  0x23   : > { %p515_p3 = scmp.ne.s32.totalorder %s708_s8, %s514_s28  ;;  %s519_s30 = sshll.u32 %s613_s29, 4  ;;  %s520_s30 = int_to_ptr.vmem [resolvable:$false] %s519_s30 }
  0x24   : > { %s521_s4 = scalar_lea.vmem %s520_s30, 256  ;;  %p522_p9 = scmp.lt.s32.totalorder %s708_s8, %s520_s30 }
  0x25   : > { %p517_p6 = pnand %p515_p3, %p501_p5  ;;  %p523_p4 = scmp.lt.s32.totalorder %s521_s4, %s514_s28 }
  0x27   : > { %p518_p11 = pneg %p517_p6  ;;  %p524_p10 = por %p523_p4, %p522_p9 }
  0x29   : > { %p525_p12 = pnand %p524_p10, %p518_p11 }
  0x2b   : > { %528 = shalt.err (!%p525_p12)
}
  0x2c   : > { %432 = dma.hbm_to_vmem [thread:$0]  (!%p712_p0), %s706_s6, 128, %s708_s8, %s154_s10  }
  0x2d   : > { %p833_p1 = scmp.lt.s32.totalorder %s611_s17, 3  ;;  %p834_p2 = scmp.ge.s32.totalorder %s611_s17, 1 }
  0x2f   : > { %p173_p5 = pnand %p834_p2, %p833_p1 }
  0x30   : > { %s748_s5 = sand.u32 (!%p173_p5), 1, %s595_s13  }
  0x31   : > { %176 = sbr.rel (%p173_p5) target bundleno = 209 (0xd1), region = 32  ;;  %s416_s7 = sshll.u32 (!%p173_p5), %s748_s5, 3 }
  0x32   : > { %s179_s11 = scalar_lea.sflag (!%p173_p5), [#allocation3], %s748_s5  ;;  %s182_s9 = scalar_lea.vmem (!%p173_p5), [#allocation2], %s416_s7 }
  0x38   : > { %582 = dma.done.wait (%p684_p8), %s179_s11, 128  }
  0x39   : > { %584 = vsyncadd (%p684_p8), %s179_s11, 4294967168  ;;  %v614_v0 = vmov 0   ;;  %v278_v1 = vld [vmem:[%s824_s1] sm:$0xf]  ;;  %vm211_vm0 = vcmask 1043456   ;;  %v287_v55 = vlaneseq  ;;  %s424_s24 = sshll.u32 %s603_s15, 7 }
  0x3a   : > { %489 = vset.pattern.permute.xlu0 %v614_v0  ;;  %v207_v2 = vld [vmem:[%s182_s9] sm:$0xff]  ;;  %v615_v53 = vmov 839922192   ;;  %s204_s19 = scalar_lea.vmem [#allocation5], %s416_s7  ;;  %s774_s28 = scalar_lea.hbm %s826_s3, %s424_s24 }
  0x3b   : > { %282 = vperm.xlu0 %489, %v278_v1   ;;  %v279_v3 = vld [vmem:[%s825_s2] sm:$0xf]  ;;  %v209_v4 = vcombine.high %v207_v2, %v207_v2  ;;  %v212_v5 = vsel %vm211_vm0, %v207_v2, 0.0  ;;  %v285_v54 = vunpack.c.l.s4 %v615_v53  ;;  %v288_v58 = vshrl.u32 %v287_v55, 7  ;;  %s324_s21 = sshll.u32 %s204_s19, 4  ;;  %s308_s29 = scalar_lea.sflag [#allocation4], %s748_s5  ;;  %s776_s21 = int_to_ptr.vmem [resolvable:$true] %s324_s21 }
  0x3c   : > { %v213_v7 = vrot.slane %v212_v5, 4  ;;  %s529_s30 = scalar_lea.vmem %s776_s21, 128  ;;  %p835_p9 = scmp.ne.s32.totalorder %s830_s25, 0 }
  0x3d   : > { %v219_v6 = vsel %vm211_vm0, %v209_v4, 0.0  ;;  %v286_v57 = vunpack.c.0.s8 %v285_v54  ;;  %p530_p8 = scmp.ne.s32.totalorder %s776_s21, %s529_s30  ;;  %s616_s15 = smov [#allocation5]  }
  0x3e   : > { %v220_v8 = vrot.slane %v219_v6, 4  ;;  %v214_v9 = vadd.f32 %v213_v7, %v212_v5  ;;  %s533_s4 = sshll.u32 %s616_s15, 4  ;;  %s534_s4 = int_to_ptr.vmem [resolvable:$false] %s533_s4 }
  0x3f   : > { %295 = vperm.xlu0 %489, %v279_v3   ;;  %v289_v60 = vsub.s32 %v286_v57, %v288_v58  ;;  %p531_p11 = pnand %p530_p8, %p835_p9  ;;  %s535_s7 = scalar_lea.vmem %s534_s4, 256 }
  0x40   : > { %v221_v10 = vadd.f32 %v220_v8, %v219_v6  ;;  %v215_v11 = vrot.slane %v214_v9, 2  ;;  %p536_p7 = scmp.lt.s32.totalorder %s776_s21, %s534_s4  ;;  %p537_p13 = scmp.lt.s32.totalorder %s535_s7, %s529_s30 }
  0x41   : > { %p532_p0 = pneg %p531_p11 }
  0x42   : > { %v222_v12 = vrot.slane %v221_v10, 2  ;;  %v216_v13 = vadd.f32 %v215_v11, %v214_v9  ;;  %p538_p3 = por %p537_p13, %p536_p7 }
  0x44   : > { %v223_v14 = vadd.f32 %v222_v12, %v221_v10  ;;  %v217_v15 = vrot.slane %v216_v13, 1  ;;  %p539_p6 = pnand %p538_p3, %p532_p0 }
  0x46   : > { %v224_v16 = vrot.slane %v223_v14, 1  ;;  %v218_v17 = vadd.f32 %v217_v15, %v216_v13 }
  0x48   : > { %v225_v18 = vadd.f32 %v224_v16, %v223_v14  ;;  %v227_v19 = vmul.f32 0.25, %v218_v17 }
  0x4a   : > { %v228_v20 = vmul.f32 0.25, %v225_v18 }
  0x4c   : > { %v231_v21 = vcombine.low %v227_v19, %v228_v20 }
  0x4e   : > { %v233_v22 = vsub.f32 %v207_v2, %v231_v21 }
  0x50   : > { %v234_v23 = vmul.f32 %v233_v22, %v233_v22 }
  0x52   : > { %v236_v24 = vcombine.high %v234_v23, %v234_v23  ;;  %v238_v25 = vsel %vm211_vm0, %v234_v23, 0.0 }
  0x53   : > { %v239_v27 = vrot.slane %v238_v25, 4 }
  0x54   : > { %v245_v26 = vsel %vm211_vm0, %v236_v24, 0.0 }
  0x55   : > { %v246_v28 = vrot.slane %v245_v26, 4  ;;  %v240_v29 = vadd.f32 %v239_v27, %v238_v25 }
  0x57   : > { %v247_v30 = vadd.f32 %v246_v28, %v245_v26  ;;  %v241_v31 = vrot.slane %v240_v29, 2 }
  0x59   : > { %v248_v32 = vrot.slane %v247_v30, 2  ;;  %v242_v33 = vadd.f32 %v241_v31, %v240_v29 }
  0x5b   : > { %v249_v34 = vadd.f32 %v248_v32, %v247_v30  ;;  %v243_v35 = vrot.slane %v242_v33, 1 }
  0x5d   : > { %v250_v36 = vrot.slane %v249_v34, 1  ;;  %v244_v37 = vadd.f32 %v243_v35, %v242_v33 }
  0x5f   : > { %v251_v38 = vadd.f32 %v250_v36, %v249_v34  ;;  %v253_v39 = vmul.f32 0.33333334, %v244_v37 }
  0x61   : > { %v254_v40 = vmul.f32 0.33333334, %v251_v38  ;;  %491 = vrsqrt.f32 %v253_v39  ;;  %vm257_vm1 = vcmp.eq.f32.partialorder %v253_v39, inf  ;;  %v260_v45 = vand.u32 2147483648, %v253_v39 }
  0x62   : > { %vm259_vm3 = vcmp.eq.f32.partialorder %v253_v39, 0.0 }
  0x63   : > { %493 = vrsqrt.f32 %v254_v40  ;;  %vm264_vm2 = vcmp.eq.f32.partialorder %v254_v40, inf  ;;  %v267_v47 = vand.u32 2147483648, %v254_v40  ;;  %vm266_vm4 = vcmp.eq.f32.partialorder %v254_v40, 0.0 }
  0x6b   : > { %v492_v41 = vpop.eup %491 }
  0x6c   : > { %v256_v43 = vmul.f32 %v492_v41, %v253_v39 }
  0x6d   : > { %v494_v42 = vpop.eup %493 }
  0x6e   : > { %v263_v44 = vmul.f32 %v494_v42, %v254_v40  ;;  %v258_v46 = vsel %vm257_vm1, %v253_v39, %v256_v43 }
  0x6f   : > { %v261_v49 = vsel %vm259_vm3, %v260_v45, %v258_v46 }
  0x70   : > { %v265_v48 = vsel %vm264_vm2, %v254_v40, %v263_v44  ;;  %v269_v51 = vadd.f32 1e-05, %v261_v49 }
  0x71   : > { %v268_v50 = vsel %vm266_vm4, %v267_v47, %v265_v48 }
  0x72   : > { %v270_v52 = vadd.f32 1e-05, %v268_v50  ;;  %495 = vrcp.f32 %v269_v51 }
  0x74   : > { %497 = vrcp.f32 %v270_v52 }
  0x7c   : > { %v496_v56 = vpop.eup %495 }
  0x7e   : > { %v498_v59 = vpop.eup %497 }
  0x7f   : > { %v275_v61 = vcombine.low %v496_v56, %v498_v59 }
  0x81   : > { %v277_v63 = vmul.f32 %v275_v61, %v233_v22 }
  0xba   : > { %v283_v62 = vpop.permute.xlu0 %282 }
  0xbb   : > { %v290_v0 = vrot.slane %v283_v62, %v289_v60 }
  0xbd   : > { %v292_v2 = vmul.f32 %v290_v0, %v277_v63 }
  0xbe   : > { %v296_v1 = vpop.permute.xlu0 %295 }
  0xbf   : > { %v303_v3 = vrot.slane %v296_v1, %v289_v60 }
  0xc1   : > { %v305_v4 = vadd.f32 %v303_v3, %v292_v2 }
  0xc3   : > { %306 = vst [vmem:[%s204_s19] sm:$0xff] %v305_v4 }
  0xc4   : > { %542 = shalt.err (!%p539_p6)
}
  0xc5   : > { %s543_s5 = scalar_lea.hbm %s774_s28, 128  ;;  %s547_s6 = scalar_lea.hbm %s826_s3, 256 }
  0xc6   : > { %p544_p4 = scmp.ne.s32.totalorder %s774_s28, %s543_s5  ;;  %p548_p1 = scmp.lt.u32.totalorder %s774_s28, %s826_s3 }
  0xc7   : > { %p549_p2 = scmp.lt.u32.totalorder %s547_s6, %s543_s5  ;;  %p551_p8 = scmp.lt.u32.totalorder %s543_s5, %s774_s28 }
  0xc8   : > { %p545_p10 = pnand %p544_p4, %p835_p9 }
  0xc9   : > { %p550_p5 = por %p549_p2, %p548_p1 }
  0xca   : > { %p546_p12 = pneg %p545_p10 }
  0xcb   : > { %p552_p11 = por %p551_p8, %p550_p5 }
  0xcd   : > { %p553_p0 = pnand %p552_p11, %p546_p12 }
  0xcf   : > { %556 = shalt.err (!%p553_p0)
}
  0xd0   : > { %427 = dma.vmem_to_hbm [thread:$0]  (%p835_p9), %s776_s21, 128, %s774_s28, %s308_s29  }
  0xd1 PF: > { %s336_s18 = sand.u32 1, %s591_s12   ;;  %p836_p7 = scmp.ne.s32.totalorder %s831_s27, 0 }
  0xd2   : > { %p837_p13 = scmp.ge.s32.totalorder %s611_s17, 2  ;;  %s337_s24 = scalar_lea.sflag [#allocation4], %s336_s18 }
  0xd4   : > { %p434_p3 = pnand %p837_p13, %p836_p7 }
  0xd6   : > { %586 = dma.done.wait (!%p434_p3), %s337_s24, 128  }
  0xd7   : > { %588 = vsyncadd (!%p434_p3), %s337_s24, 4294967168  ;;  %s19_s17 = sadd.s32 1, %s611_s17   ;;  %s838_s12 = smov %s595_s13 }
  0xd8   : > { %p16_p6 = scmp.ge.s32.totalorder %s19_s17, 4   ;;  %s839_s13 = smov %s599_s14 }
  0xd9   : > { %s840_s14 = smov %s693_s26  ;;  %s841_s15 = smov %s607_s16 }
  0xda   : > { %s842_s16 = smov %s844_s20  ;;  %18 = sbr.rel (!%p16_p6) target bundleno = 6 (0x6), region = 77 }
  0xe1   :  { %342 = vsyncpa [#allocation3], 1 }
  0xe2   :  { %344 = vsyncpa [#allocation3 + $0x1], 1 }
  0xe3   :  { %345 = vsyncpa [#allocation4], 1 }
  0xe4   :  { %347 = vsyncpa [#allocation4 + $0x1], 1 }

</bundles_post_ra>
